<compile_context>
chip_gen: v7x
topology: tpu7x:2x2x1
jax: 0.10.0
libtpu: 0.0.40
codegen_flags: <defaults>
</compile_context>

<pallas_src>
import jax
import jax.numpy as jnp
from jax import lax
from jax.experimental import pallas as pl
from jax.experimental.pallas import tpu as pltpu


def _round_up(x, m):
    return ((x + m - 1) // m) * m


def char_cnn_forward(char_ids, emb_table, conv_w, conv_b):
    """CharCNN.get_last_hiddens (eval mode).

    char_ids : (B, L) int32
    emb_table: (V, E) f32
    conv_w   : (H, E, 3) f32   (torch Conv1d weight layout)
    conv_b   : (H,) f32
    returns  : (B, H) f32
    """
    B, L = char_ids.shape
    V, E = emb_table.shape
    H = conv_w.shape[0]

    HP = _round_up(H, 128)            # lane-dense output channels
    VP = _round_up(V, 128)            # one-hot contraction width (MXU K dim)

    # Batch tile: target ~1024 MXU rows (TB*L) per grid step, but don't
    # over-pad tiny batches.  TB is a multiple of 8 for sublane alignment.
    tb_big = _round_up(max(1, (1024 + L - 1) // L), 8)
    TB = max(8, min(tb_big, _round_up(B, 8)))
    B_pad = _round_up(B, TB)
    n_grid = B_pad // TB
    ROWS = TB * L

    # ---- wrapper-side prep (tiny, one-off; no activation-sized tensors) ----
    ids = jnp.pad(char_ids.astype(jnp.int32), ((0, B_pad - B), (0, 0)))
    ids_col = ids.reshape(B_pad * L, 1)                      # one char id per sublane

    emb_p = jnp.pad(emb_table, ((0, VP - V), (0, 0))).astype(jnp.bfloat16)   # (VP, E)

    # Conv taps: torch (H, E, 3) -> (3, E, HP) -> one (E, 3*HP) matrix; tap k
    # lives in lanes [k*HP, (k+1)*HP).
    w_t = jnp.transpose(conv_w, (2, 1, 0))                    # (3, E, H)
    w_t = jnp.pad(w_t, ((0, 0), (0, 0), (0, HP - H)))         # (3, E, HP)
    w_cat = jnp.transpose(w_t, (1, 0, 2)).reshape(E, 3 * HP).astype(jnp.bfloat16)
    b_row = jnp.pad(conv_b.astype(jnp.float32), (0, HP - H)).reshape(1, HP)

    def kernel(ids_ref, emb_ref, w_ref, b_ref, out_ref):
        # ids_ref: (ROWS, 1) i32  -- char ids for TB words (rows on sublanes)
        # emb_ref: (VP, E)   bf16 -- embedding table (VMEM-resident)
        # w_ref  : (E, 3*HP) bf16 -- 3 conv taps packed along lanes (resident)
        # b_ref  : (1, HP)   f32  -- conv bias (resident)
        # out_ref: (TB, HP)  f32  -- max-pooled conv features
        ids_v = ids_ref[...]                                               # (ROWS, 1)

        # Embedding gather as a one-hot MXU matmul (exactly selects bf16 rows).
        vocab = lax.broadcasted_iota(jnp.int32, (ROWS, VP), 1)
        oh = jnp.where(vocab == ids_v, 1.0, 0.0).astype(jnp.bfloat16)      # (ROWS, VP)
        e = jnp.dot(oh, emb_ref[...],
                    preferred_element_type=jnp.float32).astype(jnp.bfloat16)  # (ROWS, E)

        # All three conv taps in one bf16 matmul with f32 accumulation.
        y = jnp.dot(e, w_ref[...], preferred_element_type=jnp.float32)     # (ROWS, 3*HP)
        y = y.reshape(TB, L, 3 * HP)
        A = y[:, :, 0:HP]           # W0 . x[t]  -> contributes to out[t+1]
        Bc = y[:, :, HP:2 * HP]     # W1 . x[t]  -> contributes to out[t]
        C = y[:, :, 2 * HP:]        # W2 . x[t]  -> contributes to out[t-1]

        # Conv1d(k=3, padding=1): out[t] = A[t-1] + Bc[t] + C[t+1] with zero
        # padding at the word edges; max-pool over t (static Python branches
        # keep this correct for any L).
        if L >= 2:
            pooled = jnp.max(Bc[:, 0:1, :] + C[:, 1:2, :], axis=1)                    # t = 0
            pooled = jnp.maximum(
                pooled,
                jnp.max(A[:, L - 2:L - 1, :] + Bc[:, L - 1:L, :], axis=1))            # t = L-1
        else:
            pooled = jnp.max(Bc[:, 0:1, :], axis=1)
        if L >= 3:
            mid = A[:, 0:L - 2, :] + Bc[:, 1:L - 1, :] + C[:, 2:L, :]                 # t = 1..L-2
            pooled = jnp.maximum(pooled, jnp.max(mid, axis=1))

        # Bias is per-channel, so max(y) + b == max(y + b).  Full-lane store.
        out_ref[...] = (pooled + b_ref[...]).astype(out_ref.dtype)

    out = pl.pallas_call(
        kernel,
        out_shape=jax.ShapeDtypeStruct((B_pad, HP), jnp.float32),
        grid=(n_grid,),
        in_specs=[
            pl.BlockSpec((ROWS, 1), lambda i: (i, 0)),        # char ids tile
            pl.BlockSpec((VP, E), lambda i: (0, 0)),          # resident emb table
            pl.BlockSpec((E, 3 * HP), lambda i: (0, 0)),      # resident conv weights
            pl.BlockSpec((1, HP), lambda i: (0, 0)),          # resident bias
        ],
        out_specs=pl.BlockSpec((TB, HP), lambda i: (i, 0)),
        compiler_params=pltpu.CompilerParams(
            dimension_semantics=("parallel",)),
    )(ids_col, emb_p, w_cat, b_row)

    return out[:B, :H]


def reference_forward(char_ids, emb_table, conv_w, conv_b, match_bf16=False):
    # Pure-JAX reference mirroring torch: Conv1d on NCL + max over length.
    embeds = jnp.take(emb_table, char_ids, axis=0)                 # (B, L, E)
    if match_bf16:
        # Mirror the kernel's bf16-input / f32-accumulate numerics.
        embeds = embeds.astype(jnp.bfloat16).astype(jnp.float32)
        conv_w = conv_w.astype(jnp.bfloat16).astype(jnp.float32)
    x_ncl = jnp.transpose(embeds, (0, 2, 1))                       # (B, E, L)
    y = lax.conv_general_dilated(
        x_ncl, conv_w, window_strides=(1,), padding=[(1, 1)],
        dimension_numbers=('NCH', 'OIH', 'NCH'))                   # (B, H, L)
    y = y + conv_b[None, :, None]
    return jnp.max(y, axis=2)                                      # (B, H)


if __name__ == "__main__":
    # Small shapes consistent with the module.
    alphabet_size = 50
    embedding_dim = 32
    hidden_dim = 32
    batch = 2
    word_length = 16

    key = jax.random.PRNGKey(0)
    k_emb, k_w, k_b, k_ids = jax.random.split(key, 4)

    # Deterministic parameter init (shapes match the torch module).
    scale = jnp.sqrt(3.0 / embedding_dim)
    emb_table = jax.random.uniform(
        k_emb, (alphabet_size, embedding_dim),
        minval=-scale, maxval=scale, dtype=jnp.float32)
    conv_w = jax.random.normal(
        k_w, (hidden_dim, embedding_dim, 3), dtype=jnp.float32) * 0.1
    conv_b = jax.random.normal(k_b, (hidden_dim,), dtype=jnp.float32) * 0.1

    char_ids = jax.random.randint(
        k_ids, (batch, word_length), 0, alphabet_size, dtype=jnp.int32)

    out = char_cnn_forward(char_ids, emb_table, conv_w, conv_b)
    out = jax.block_until_ready(out)

    ref_bf16 = jax.block_until_ready(
        reference_forward(char_ids, emb_table, conv_w, conv_b, match_bf16=True))
    ref_f32 = jax.block_until_ready(
        reference_forward(char_ids, emb_table, conv_w, conv_b, match_bf16=False))

    assert out.shape == (batch, hidden_dim)
    assert jnp.allclose(out, ref_bf16, atol=1e-3, rtol=1e-3), \
        "mismatch vs bf16-matched reference"
    assert jnp.allclose(out, ref_f32, atol=2e-2, rtol=2e-2), \
        "mismatch vs f32 reference"

    print("KERNEL_OK")
</pallas_src>

<mosaic_0001>
module attributes {stable_mosaic.version = 11 : i64} {
  func.func @kernel(%arg0: i32, %arg1: memref<128x1xi32, #tpu.memory_space<vmem>>, %arg2: memref<128x32xbf16, #tpu.memory_space<vmem>>, %arg3: memref<32x384xbf16, #tpu.memory_space<vmem>>, %arg4: memref<1x128xf32, #tpu.memory_space<vmem>>, %arg5: memref<8x128xf32, #tpu.memory_space<vmem>>) attributes {dimension_semantics = [#tpu.dimension_semantics<parallel>], iteration_bounds = array<i64: 1>, scalar_prefetch = 0 : i64, scratch_operands = 0 : i64, tpu.core_type = #tpu.core_type<tc>, window_params = [{transform_indices = @transform_0, window_bounds = array<i64: 128, 1>}, {pipeline_mode = #tpu.pipeline_mode<synchronous>, transform_indices = @transform_1, window_bounds = array<i64: 128, 32>}, {pipeline_mode = #tpu.pipeline_mode<synchronous>, transform_indices = @transform_2, window_bounds = array<i64: 32, 384>}, {pipeline_mode = #tpu.pipeline_mode<synchronous>, transform_indices = @transform_3, window_bounds = array<i64: 1, 128>}, {transform_indices = @transform_4, window_bounds = array<i64: 8, 128>}]} {
    %c0 = arith.constant 0 : index
    %c0_0 = arith.constant 0 : index
    %0 = vector.load %arg1[%c0, %c0_0] : memref<128x1xi32, #tpu.memory_space<vmem>>, vector<128x1xi32>
    %1 = tpu.iota {dimensions = array<i32: 1>} : vector<128x128xi32>
    %2 = vector.broadcast %0 : vector<128x1xi32> to vector<128x128xi32>
    %3 = arith.cmpi eq, %1, %2 : vector<128x128xi32>
    %cst = arith.constant 1.000000e+00 : f32
    %cst_1 = arith.constant 0.000000e+00 : f32
    %4 = vector.broadcast %cst : f32 to vector<128x128xf32>
    %5 = vector.broadcast %cst_1 : f32 to vector<128x128xf32>
    %6 = arith.select %3, %4, %5 : vector<128x128xi1>, vector<128x128xf32>
    %7 = arith.truncf %6 : vector<128x128xf32> to vector<128x128xbf16>
    %c0_2 = arith.constant 0 : index
    %c0_3 = arith.constant 0 : index
    %8 = vector.load %arg2[%c0_2, %c0_3] : memref<128x32xbf16, #tpu.memory_space<vmem>>, vector<128x32xbf16>
    %cst_4 = arith.constant dense<0.000000e+00> : vector<128x32xf32>
    %9 = tpu.matmul %7, %8, %cst_4 {dimension_numbers = #tpu.dot_dimension_numbers<[1], [0], [0], [1], [0, 0, 1, 1], [], []>} : vector<128x128xbf16>, vector<128x32xbf16>, vector<128x32xf32> -> vector<128x32xf32>
    %10 = arith.truncf %9 : vector<128x32xf32> to vector<128x32xbf16>
    %c0_5 = arith.constant 0 : index
    %c0_6 = arith.constant 0 : index
    %11 = vector.load %arg3[%c0_5, %c0_6] : memref<32x384xbf16, #tpu.memory_space<vmem>>, vector<32x384xbf16>
    %cst_7 = arith.constant dense<0.000000e+00> : vector<128x384xf32>
    %12 = tpu.matmul %10, %11, %cst_7 {dimension_numbers = #tpu.dot_dimension_numbers<[1], [0], [0], [1], [0, 0, 1, 1], [], []>} : vector<128x32xbf16>, vector<32x384xbf16>, vector<128x384xf32> -> vector<128x384xf32>
    %13 = vector.shape_cast %12 : vector<128x384xf32> to vector<8x16x384xf32>
    %14 = vector.extract_strided_slice %13 {offsets = [0, 0, 0], sizes = [8, 16, 128], strides = [1, 1, 1]} : vector<8x16x384xf32> to vector<8x16x128xf32>
    %15 = vector.extract_strided_slice %13 {offsets = [0, 0, 128], sizes = [8, 16, 128], strides = [1, 1, 1]} : vector<8x16x384xf32> to vector<8x16x128xf32>
    %16 = vector.extract_strided_slice %13 {offsets = [0, 0, 256], sizes = [8, 16, 128], strides = [1, 1, 1]} : vector<8x16x384xf32> to vector<8x16x128xf32>
    %17 = vector.extract_strided_slice %15 {offsets = [0, 0, 0], sizes = [8, 1, 128], strides = [1, 1, 1]} : vector<8x16x128xf32> to vector<8x1x128xf32>
    %18 = vector.extract_strided_slice %16 {offsets = [0, 1, 0], sizes = [8, 1, 128], strides = [1, 1, 1]} : vector<8x16x128xf32> to vector<8x1x128xf32>
    %19 = arith.addf %17, %18 : vector<8x1x128xf32>
    %cst_8 = arith.constant dense<0xFF800000> : vector<8x128xf32>
    %20 = vector.multi_reduction <maximumf>, %19, %cst_8 [1] : vector<8x1x128xf32> to vector<8x128xf32>
    %21 = vector.extract_strided_slice %14 {offsets = [0, 14, 0], sizes = [8, 1, 128], strides = [1, 1, 1]} : vector<8x16x128xf32> to vector<8x1x128xf32>
    %22 = vector.extract_strided_slice %15 {offsets = [0, 15, 0], sizes = [8, 1, 128], strides = [1, 1, 1]} : vector<8x16x128xf32> to vector<8x1x128xf32>
    %23 = arith.addf %21, %22 : vector<8x1x128xf32>
    %cst_9 = arith.constant dense<0xFF800000> : vector<8x128xf32>
    %24 = vector.multi_reduction <maximumf>, %23, %cst_9 [1] : vector<8x1x128xf32> to vector<8x128xf32>
    %25 = arith.maximumf %20, %24 : vector<8x128xf32>
    %26 = vector.extract_strided_slice %14 {offsets = [0, 0, 0], sizes = [8, 14, 128], strides = [1, 1, 1]} : vector<8x16x128xf32> to vector<8x14x128xf32>
    %27 = vector.extract_strided_slice %15 {offsets = [0, 1, 0], sizes = [8, 14, 128], strides = [1, 1, 1]} : vector<8x16x128xf32> to vector<8x14x128xf32>
    %28 = arith.addf %26, %27 : vector<8x14x128xf32>
    %29 = vector.extract_strided_slice %16 {offsets = [0, 2, 0], sizes = [8, 14, 128], strides = [1, 1, 1]} : vector<8x16x128xf32> to vector<8x14x128xf32>
    %30 = arith.addf %28, %29 : vector<8x14x128xf32>
    %cst_10 = arith.constant dense<0xFF800000> : vector<8x128xf32>
    %31 = vector.multi_reduction <maximumf>, %30, %cst_10 [1] : vector<8x14x128xf32> to vector<8x128xf32>
    %32 = arith.maximumf %25, %31 : vector<8x128xf32>
    %c0_11 = arith.constant 0 : index
    %c0_12 = arith.constant 0 : index
    %33 = vector.load %arg4[%c0_11, %c0_12] : memref<1x128xf32, #tpu.memory_space<vmem>>, vector<1x128xf32>
    %34 = vector.broadcast %33 : vector<1x128xf32> to vector<8x128xf32>
    %35 = arith.addf %32, %34 : vector<8x128xf32>
    %c0_13 = arith.constant 0 : index
    %c0_14 = arith.constant 0 : index
    %36 = vector.load %arg5[%c0_13, %c0_14] : memref<8x128xf32, #tpu.memory_space<vmem>>, vector<8x128xf32>
    tpu.vector_store %arg5[%c0_13, %c0_14], %35 {strides = array<i32>} : memref<8x128xf32, #tpu.memory_space<vmem>>, vector<8x128xf32>,
    return
  }
  func.func @transform_0(%arg0: i32) -> (i32, i32) {
    %c0_i32 = arith.constant 0 : i32
    %c0_i32_0 = arith.constant 0 : i32
    return %arg0, %c0_i32 : i32, i32
  }
  func.func @transform_1(%arg0: i32) -> (i32, i32) {
    %c0_i32 = arith.constant 0 : i32
    %c0_i32_0 = arith.constant 0 : i32
    %c0_i32_1 = arith.constant 0 : i32
    return %c0_i32, %c0_i32_0 : i32, i32
  }
  func.func @transform_2(%arg0: i32) -> (i32, i32) {
    %c0_i32 = arith.constant 0 : i32
    %c0_i32_0 = arith.constant 0 : i32
    %c0_i32_1 = arith.constant 0 : i32
    return %c0_i32, %c0_i32_0 : i32, i32
  }
  func.func @transform_3(%arg0: i32) -> (i32, i32) {
    %c0_i32 = arith.constant 0 : i32
    %c0_i32_0 = arith.constant 0 : i32
    %c0_i32_1 = arith.constant 0 : i32
    return %c0_i32, %c0_i32_0 : i32, i32
  }
  func.func @transform_4(%arg0: i32) -> (i32, i32) {
    %c0_i32 = arith.constant 0 : i32
    %c0_i32_0 = arith.constant 0 : i32
    return %arg0, %c0_i32 : i32, i32
  }
}

</mosaic_0001>

<bundles_post_ra>
// kernel: tpu_custom_call.1
= control target key start
LH: loop header
LB: loop body
LE: loop exit
PB: predicated region body
PF: predicated region fallthrough
CT: control target
= control target key end

     0   :  { %v1077_v2 = vmov 0   ;;  %s1318_s0 = inlined_call_operand.vmem [shape: s32[128,1], index: 0, kind: input, shape index: {}]   ;;  %s1319_s1 = inlined_call_operand.vmem [shape: bf16[128,32], index: 1, kind: input, shape index: {}]   ;;  %s1320_s2 = inlined_call_operand.vmem [shape: bf16[32,384], index: 2, kind: input, shape index: {}]   ;;  %s1321_s3 = inlined_call_operand.vmem [shape: f32[1,128], index: 3, kind: input, shape index: {}]   ;;  %s1322_s4 = inlined_call_operand.hbm [shape: f32[8,128], index: 4, kind: output, shape index: {}]  }
   0x1   :  { %v21_v0 = vld [vmem:[%s1318_s0 + $0x10] sm:$0xff]  ;;  %v19_v1 = vld [vmem:[%s1318_s0] sm:$0xff]  ;;  %1036 = vset.pattern.permute.xlu1 %v1077_v2  ;;  %1035 = vset.pattern.permute.xlu0 %v1077_v2  ;;  %v22_v3 = vld [vmem:[%s1318_s0 + $0x18] sm:$0xff] }
   0x2   :  { %44 = vperm.xlu1 %1036, %v21_v0   ;;  %38 = vperm.xlu0 %1035, %v19_v1   ;;  %v20_v4 = vld [vmem:[%s1318_s0 + $0x8] sm:$0xff]  ;;  %v23_v6 = vld [vmem:[%s1318_s0 + $0x20] sm:$0xff]  ;;  %v26_v9 = vld [vmem:[%s1318_s0 + $0x38] sm:$0xff] }
   0x3   :  { %391 = vmatprep.mubr.bf16.mxu1 %v1077_v2  ;;  %v24_v5 = vld [vmem:[%s1318_s0 + $0x28] sm:$0xff]  ;;  %v1037_v7 = vld [vmem:[%s1319_s1] sm:$0xff]   ;;  %v25_v10 = vld [vmem:[%s1318_s0 + $0x30] sm:$0xff] }
   0x4   :  { %v1038_v8 = vld [vmem:[%s1319_s1 + $0x8] sm:$0xff]   ;;  %976 = vmatprep.subr.bf16.mxu0 %v1037_v7  ;;  %v1039_v11 = vld [vmem:[%s1319_s1 + $0x10] sm:$0xff]   ;;  %v27_v13 = vld [vmem:[%s1318_s0 + $0x40] sm:$0xff] }
   0x5   :  { %977 = vmatpush3.bf16.msra.mxu0 %v1037_v7  ;;  %v28_v12 = vld [vmem:[%s1318_s0 + $0x48] sm:$0xff]  ;;  %v1040_v14 = vld [vmem:[%s1319_s1 + $0x18] sm:$0xff]  }
   0x6   :  { %47 = vperm.xlu1 %1036, %v22_v3   ;;  %41 = vperm.xlu0 %1035, %v20_v4  }
   0x7   :  { %978 = vmatprep.subr.bf16.mxu0 %v1038_v8 }
   0x9   :  { %979 = vmatpush3.bf16.msra.mxu0 %v1038_v8 }
   0xa   :  { %53 = vperm.xlu1 %1036, %v24_v5   ;;  %50 = vperm.xlu0 %1035, %v23_v6  }
   0xb   :  { %980 = vmatprep.subr.bf16.mxu0 %v1039_v11 }
   0xe   :  { %59 = vperm.xlu1 %1036, %v26_v9   ;;  %56 = vperm.xlu0 %1035, %v25_v10  }
   0xf   :  { %9 = vsyncpa [#allocation3], 0  ;;  %981 = vmatpush3.bf16.msra.mxu0 %v1039_v11  ;;  %v30_v15 = vld [vmem:[%s1318_s0 + $0x58] sm:$0xff]  ;;  %v29_v16 = vld [vmem:[%s1318_s0 + $0x50] sm:$0xff]  ;;  %v35_v28 = vlaneseq  ;;  %v1078_v34 = vmov 1.0|1.0  }
  0x10   :  { %982 = vmatprep.subr.bf16.mxu0 %v1040_v14  ;;  %v1041_v17 = vld [vmem:[%s1319_s1 + $0x20] sm:$0xff]   ;;  %v32_v18 = vld [vmem:[%s1318_s0 + $0x68] sm:$0xff]  ;;  %v34_v21 = vld [vmem:[%s1318_s0 + $0x78] sm:$0xff] }
  0x11   :  { %v31_v19 = vld [vmem:[%s1318_s0 + $0x60] sm:$0xff]  ;;  %v1042_v20 = vld [vmem:[%s1319_s1 + $0x28] sm:$0xff]   ;;  %v33_v22 = vld [vmem:[%s1318_s0 + $0x70] sm:$0xff]  ;;  %v36_v31 = vand.u32 127, %v35_v28 }
  0x12   :  { %65 = vperm.xlu1 %1036, %v28_v12   ;;  %62 = vperm.xlu0 %1035, %v27_v13   ;;  %v1043_v23 = vld [vmem:[%s1319_s1 + $0x30] sm:$0xff]   ;;  %v1044_v24 = vld [vmem:[%s1319_s1 + $0x38] sm:$0xff]   ;;  %v1047_v26 = vld [vmem:[%s1320_s2] ss:$12 sps:$4 sm:$0xff]  }
  0x13   :  { %983 = vmatpush3.bf16.msra.mxu0 %v1040_v14  ;;  %v1045_v25 = vld [vmem:[%s1320_s2 + $0x4] ss:$12 sps:$4 sm:$0xff]   ;;  %v1189_v27 = vld [vmem:[%s1320_s2 + $0x8] ss:$12 sps:$4 sm:$0xff]   ;;  %v1052_v49 = vld [vmem:[%s1320_s2 + $0x20] ss:$12 sps:$4 sm:$0xff]  }
  0x14   :  { %984 = vmatprep.subr.bf16.mxu0 %v1041_v17  ;;  %359 = vmatprep.subr.bf16.mxu1 %v1045_v25  ;;  %v1049_v47 = vld [vmem:[%s1320_s2 + $0x1c] ss:$12 sps:$4 sm:$0xff]   ;;  %v1051_v48 = vld [vmem:[%s1320_s2 + $0x18] ss:$12 sps:$4 sm:$0xff]  }
  0x15   :  { %360 = vmatpush1.bf16.msra.mxu1 %v1047_v26 }
  0x16   :  { %71 = vperm.xlu1 %1036, %v30_v15   ;;  %68 = vperm.xlu0 %1035, %v29_v16  }
  0x17   :  { %985 = vmatpush3.bf16.msra.mxu0 %v1041_v17  ;;  %361 = vmatprep.subr.bf16.mxu1 %v1049_v47 }
  0x18   :  { %986 = vmatprep.subr.bf16.mxu0 %v1042_v20 }
  0x19   :  { %362 = vmatpush1.bf16.msra.mxu1 %v1051_v48 }
  0x1a   :  { %77 = vperm.xlu1 %1036, %v32_v18   ;;  %74 = vperm.xlu0 %1035, %v31_v19  }
  0x1b   :  { %987 = vmatpush3.bf16.msra.mxu0 %v1042_v20  ;;  %1028 = vmatprep.subr.bf16.mxu1 %v1189_v27 }
  0x1c   :  { %988 = vmatprep.subr.bf16.mxu0 %v1043_v23 }
  0x1e   :  { %83 = vperm.xlu1 %1036, %v34_v21   ;;  %80 = vperm.xlu0 %1035, %v33_v22  }
  0x1f   :  { %989 = vmatpush3.bf16.msra.mxu0 %v1043_v23 }
  0x20   :  { %990 = vmatprep.subr.bf16.mxu0 %v1044_v24 }
  0x23   :  { %991 = vmatpush3.bf16.msra.mxu0 %v1044_v24 }
  0x24   :  { %1008 = vmatprep.subr.bf16.mxu0 %v1189_v27 }
  0x81   :  { %v45_v29 = vpop.permute.xlu1 %44  ;;  %v39_v30 = vpop.permute.xlu0 %38 }
  0x82   :  { %vm87_vm0 = vcmp.eq.s32.totalorder %v36_v31, %v45_v29  ;;  %vm85_vm3 = vcmp.eq.s32.totalorder %v36_v31, %v39_v30 }
  0x85   :  { %v48_v32 = vpop.permute.xlu1 %47  ;;  %v42_v33 = vpop.permute.xlu0 %41 }
  0x86   :  { %vm88_vm1 = vcmp.eq.s32.totalorder %v36_v31, %v48_v32  ;;  %vm86_vm2 = vcmp.eq.s32.totalorder %v36_v31, %v42_v33 }
  0x87   :  { %vm913_vm4 = vmpackc.low %vm88_vm1, %vm87_vm0 }
  0x88   :  { %vm911_vm5 = vmpackc.low %vm86_vm2, %vm85_vm3 }
  0x89   :  { %992 = vmatprep.mubr.msk.bf16.mxu0 %vm911_vm5, %v1078_v34  ;;  %v54_v35 = vpop.permute.xlu1 %53  ;;  %v51_v36 = vpop.permute.xlu0 %50 }
  0x8a   :  { %vm90_vm6 = vcmp.eq.s32.totalorder %v36_v31, %v54_v35  ;;  %993 = vmatmul.mubr.msk.bf16.vlgmr.msra.gmra.mrb[0].mxu0 %vm913_vm4, %v1078_v34  ;;  %vm89_vm7 = vcmp.eq.s32.totalorder %v36_v31, %v51_v36 }
  0x8b   :  { %vm915_vm8 = vmpackc.low %vm90_vm6, %vm89_vm7  ;;  %1009 = vmatpush3.bf16.msra.mxu0 %v1189_v27 }
  0x8c   :  { %996 = vmatprep.mubr.msk.bf16.mxu0 %vm915_vm8, %v1078_v34  ;;  %1010 = vmatprep.subr.bf16.mxu0 %v1052_v49  ;;  %vm334_vm8 = vcmask 261120  }
  0x8d   :  { %v60_v37 = vpop.permute.xlu1 %59  ;;  %v57_v38 = vpop.permute.xlu0 %56 }
  0x8e   :  { %vm92_vm9 = vcmp.eq.s32.totalorder %v36_v31, %v60_v37  ;;  %vm91_vm10 = vcmp.eq.s32.totalorder %v36_v31, %v57_v38 }
  0x8f   :  { %vm917_vm11 = vmpackc.low %vm92_vm9, %vm91_vm10  ;;  %1011 = vmatpush3.bf16.msra.mxu0 %v1052_v49  ;;  %vm673_vm9 = vcmask 1046528   ;;  %vm714_vm10 = vcmask 1045504  }
  0x91   :  { %v66_v39 = vpop.permute.xlu1 %65  ;;  %v63_v40 = vpop.permute.xlu0 %62 }
  0x92   :  { %vm94_vm12 = vcmp.eq.s32.totalorder %v36_v31, %v66_v39  ;;  %997 = vmatmul.mubr.msk.bf16.gmra.mrb[4].mxu0 %vm917_vm11, %v1078_v34  ;;  %vm93_vm13 = vcmp.eq.s32.totalorder %v36_v31, %v63_v40  ;;  %vm867_vm11 = vcmask 1041409  }
  0x93   :  { %vm919_vm14 = vmpackc.low %vm94_vm12, %vm93_vm13  ;;  %vm870_vm12 = vcmask 1042434   ;;  %vm873_vm13 = vcmask 1043459  }
  0x94   :  { %1000 = vmatprep.mubr.msk.bf16.mxu0 %vm919_vm14, %v1078_v34  ;;  %vm876_vm14 = vcmask 1044484  }
  0x95   :  { %v72_v41 = vpop.permute.xlu1 %71  ;;  %v69_v42 = vpop.permute.xlu0 %68 }
  0x96   :  { %vm96_vm15 = vcmp.eq.s32.totalorder %v36_v31, %v72_v41  ;;  %vm95_vm0 = vcmp.eq.s32.totalorder %v36_v31, %v69_v42 }
  0x97   :  { %vm921_vm1 = vmpackc.low %vm96_vm15, %vm95_vm0  ;;  %vm879_vm15 = vcmask 1045509   ;;  %vm882_vm0 = vcmask 1046534  }
  0x99   :  { %v78_v43 = vpop.permute.xlu1 %77  ;;  %v75_v44 = vpop.permute.xlu0 %74 }
  0x9a   :  { %vm98_vm2 = vcmp.eq.s32.totalorder %v36_v31, %v78_v43  ;;  %1001 = vmatmul.mubr.msk.bf16.gmra.mrb[8].mxu0 %vm921_vm1, %v1078_v34  ;;  %vm97_vm3 = vcmp.eq.s32.totalorder %v36_v31, %v75_v44  ;;  %vm885_vm1 = vcmask 1047559  }
  0x9b   :  { %vm923_vm4 = vmpackc.low %vm98_vm2, %vm97_vm3 }
  0x9c   :  { %1004 = vmatprep.mubr.msk.bf16.mxu0 %vm923_vm4, %v1078_v34 }
  0x9d   :  { %v84_v45 = vpop.permute.xlu1 %83  ;;  %v81_v46 = vpop.permute.xlu0 %80 }
  0x9e   :  { %vm100_vm5 = vcmp.eq.s32.totalorder %v36_v31, %v84_v45  ;;  %vm99_vm6 = vcmp.eq.s32.totalorder %v36_v31, %v81_v46 }
  0x9f   :  { %vm925_vm7 = vmpackc.low %vm100_vm5, %vm99_vm6 }
  0xa2   :  { %1005 = vmatmul.mubr.msk.bf16.gmra.mrb[12].mxu0 %vm925_vm7, %v1078_v34 }
 0x15d   :  { %v994_v50 = vpop.f32.mrb[0].mxu0 }
 0x15e   :  { %v223_v51 = vpop.f32.mrb[1].mxu0 }
 0x15f   :  { %v995_v52 = vpop.f32.mrb[2].mxu0 }
 0x160   :  { %v287_v53 = vpack.c.bf16 %v995_v52, %v994_v50  ;;  %v226_v54 = vpop.f32.mrb[3].mxu0 }
 0x161   :  { %v286_v55 = vpack.c.bf16 %v226_v54, %v223_v51 }
 0x163   :  { %933 = vmatmul.mubr.msk.bf16.vlgmr.msra.gmra.mrb[0].mxu1 %vm334_vm8, %v286_v55  ;;  %1012 = vmatprep.mubr.msk.bf16.mxu0 %vm334_vm8, %v286_v55 }
 0x164   :  { %1030 = vmatpush3.bf16.msra.mxu1 %v1189_v27  ;;  %1013 = vmatmul.mubr.msk.bf16.vlgmr.msra.gmra.mrb[16].mxu0 %vm334_vm8, %v287_v53 }
 0x165   :  { %v998_v56 = vpop.f32.mrb[4].mxu0  ;;  %401 = vmatprep.mubr.bf16.mxu1 %v1077_v2  ;;  %1029 = vmatprep.subr.bf16.mxu1 %v1052_v49 }
 0x166   :  { %v239_v57 = vpop.f32.mrb[5].mxu0 }
 0x167   :  { %v999_v58 = vpop.f32.mrb[6].mxu0 }
 0x168   :  { %v289_v59 = vpack.c.bf16 %v999_v58, %v998_v56  ;;  %v242_v60 = vpop.f32.mrb[7].mxu0  ;;  %1031 = vmatpush3.bf16.msra.mxu1 %v1052_v49 }
 0x169   :  { %v288_v61 = vpack.c.bf16 %v242_v60, %v239_v57 }
 0x16b   :  { %934 = vmatmul.mubr.msk.bf16.gmra.mrb[4].mxu1 %vm334_vm8, %v287_v53  ;;  %1016 = vmatprep.mubr.msk.bf16.mxu0 %vm334_vm8, %v288_v61 }
 0x16c   :  { %1017 = vmatmul.mubr.msk.bf16.gmra.mrb[20].mxu0 %vm334_vm8, %v289_v59  ;;  %411 = vmatprep.mubr.bf16.mxu1 %v1077_v2 }
 0x16d   :  { %v1002_v62 = vpop.f32.mrb[8].mxu0 }
 0x16e   :  { %v255_v63 = vpop.f32.mrb[9].mxu0 }
 0x16f   :  { %v1003_v0 = vpop.f32.mrb[10].mxu0 }
 0x170   :  { %v291_v1 = vpack.c.bf16 %v1003_v0, %v1002_v62  ;;  %v258_v3 = vpop.f32.mrb[11].mxu0 }
 0x171   :  { %v290_v4 = vpack.c.bf16 %v258_v3, %v255_v63 }
 0x173   :  { %935 = vmatmul.mubr.msk.bf16.gmra.mrb[8].mxu1 %vm334_vm8, %v288_v61  ;;  %1020 = vmatprep.mubr.msk.bf16.mxu0 %vm334_vm8, %v290_v4 }
 0x174   :  { %1021 = vmatmul.mubr.msk.bf16.gmra.mrb[24].mxu0 %vm334_vm8, %v291_v1  ;;  %421 = vmatprep.mubr.bf16.mxu1 %v1077_v2 }
 0x175   :  { %v1006_v5 = vpop.f32.mrb[12].mxu0 }
 0x176   :  { %v271_v6 = vpop.f32.mrb[13].mxu0 }
 0x177   :  { %v1007_v7 = vpop.f32.mrb[14].mxu0 }
 0x178   :  { %v293_v8 = vpack.c.bf16 %v1007_v7, %v1006_v5  ;;  %v274_v9 = vpop.f32.mrb[15].mxu0 }
 0x179   :  { %v292_v10 = vpack.c.bf16 %v274_v9, %v271_v6 }
 0x17b   :  { %936 = vmatmul.mubr.msk.bf16.gmra.mrb[12].mxu1 %vm334_vm8, %v289_v59 }
 0x17c   :  { %431 = vmatprep.mubr.bf16.mxu1 %v1077_v2 }
 0x183   :  { %937 = vmatmul.mubr.msk.bf16.gmra.mrb[16].mxu1 %vm334_vm8, %v290_v4 }
 0x184   :  { %441 = vmatprep.mubr.bf16.mxu1 %v1077_v2 }
 0x18b   :  { %938 = vmatmul.mubr.msk.bf16.gmra.mrb[20].mxu1 %vm334_vm8, %v291_v1 }
 0x18c   :  { %451 = vmatprep.mubr.bf16.mxu1 %v1077_v2 }
 0x193   :  { %939 = vmatmul.mubr.msk.bf16.gmra.mrb[24].mxu1 %vm334_vm8, %v292_v10 }
 0x194   :  { %461 = vmatprep.mubr.bf16.mxu1 %v1077_v2 }
 0x19b   :  { %940 = vmatmul.mubr.msk.bf16.gmra.mrb[28].mxu1 %vm334_vm8, %v293_v8 }
 0x19c   :  { %1024 = vmatprep.mubr.msk.bf16.mxu1 %vm334_vm8, %v292_v10 }
 0x1a3   :  { %1025 = vmatmul.mubr.msk.bf16.vlgmr.msra.gmra.mrb[32].mxu1 %vm334_vm8, %v293_v8 }
 0x236   :  { %v393_v11 = vpop.f32.mrb[0].mxu1 }
 0x237   :  { %v395_v12 = vpop.f32.mrb[1].mxu1  ;;  %v1014_v13 = vpop.f32.mrb[16].mxu0 }
 0x238   :  { %v397_v14 = vpop.f32.mrb[2].mxu1  ;;  %v506_v15 = vpop.f32.mrb[17].mxu0  ;;  %v674_v19 = vrot.slane %v395_v12, 1  ;;  %v718_v20 = vrot.slane %v1014_v13, 2  ;;  %v578_v31 = vrot.slane %v1014_v13, 1 }
 0x239   :  { %v577_v16 = vrot.slane %v506_v15, 1  ;;  %v399_v17 = vpop.f32.mrb[3].mxu1  ;;  %v1015_v18 = vpop.f32.mrb[18].mxu0  ;;  %v715_v24 = vrot.slane %v506_v15, 2 }
 0x23a   :  { %v609_v21 = vrot.slane %v399_v17, 1  ;;  %v719_v2 = vrot.slane %v1015_v18, 2  ;;  %v509_v22 = vpop.f32.mrb[19].mxu0 }
 0x23b   :  { %v593_v23 = vadd.f32 %v577_v16, %v395_v12  ;;  %v716_v25 = vrot.slane %v509_v22, 2 }
 0x23c   :  { %v625_v26 = vadd.f32 %v609_v21, %v397_v14  ;;  %v675_v27 = vsel %vm673_vm9, %v674_v19, %v609_v21  ;;  %v720_v28 = vsel %vm714_vm10, %v718_v20, %v719_v2 }
 0x23d   :  { %v698_v29 = vadd.f32 %v675_v27, %v393_v11  ;;  %v717_v30 = vsel %vm714_vm10, %v715_v24, %v716_v25 }
 0x23e   :  { %v641_v32 = vrot.slane %v625_v26, 6  ;;  %v756_v33 = vadd.f32 %v716_v25, %v625_v26  ;;  %v403_v34 = vpop.f32.mrb[4].mxu1 }
 0x23f   :  { %v755_v35 = vadd.f32 %v717_v30, %v698_v29  ;;  %v405_v36 = vpop.f32.mrb[5].mxu1  ;;  %v1230_v37 = vpop.f32.mrb[20].mxu0 }
 0x240   :  { %v1232_v38 = vmax.f32 %v593_v23, %v641_v32  ;;  %v771_v39 = vsel %vm714_vm10, %v756_v33, -inf  ;;  %v594_v40 = vadd.f32 %v578_v31, %v405_v36  ;;  %v407_v41 = vpop.f32.mrb[6].mxu1  ;;  %v522_v42 = vpop.f32.mrb[21].mxu0  ;;  %v676_v46 = vrot.slane %v405_v36, 1 }
 0x241   :  { %v772_v43 = vmax.f32 %v755_v35, %v771_v39  ;;  %v409_v44 = vpop.f32.mrb[7].mxu1  ;;  %v1235_v45 = vpop.f32.mrb[22].mxu0  ;;  %v724_v47 = vrot.slane %v1230_v37, 2  ;;  %v721_v52 = vrot.slane %v522_v42, 2  ;;  %v579_v60 = vrot.slane %v522_v42, 1 }
 0x242   :  { %v610_v48 = vrot.slane %v409_v44, 1  ;;  %v725_v49 = vrot.slane %v1235_v45, 2  ;;  %v525_v50 = vpop.f32.mrb[23].mxu0  ;;  %v580_v29 = vrot.slane %v1230_v37, 1 }
 0x243   :  { %v773_v51 = vrot.slane %v772_v43, 4  ;;  %v722_v53 = vrot.slane %v525_v50, 2 }
 0x244   :  { %v626_v54 = vadd.f32 %v610_v48, %v407_v41  ;;  %v677_v55 = vsel %vm673_vm9, %v676_v46, %v610_v48  ;;  %v1243_v56 = vsel %vm714_vm10, %v724_v47, %v725_v49 }
 0x245   :  { %v774_v57 = vmax.f32 %v772_v43, %v773_v51  ;;  %v699_v58 = vadd.f32 %v677_v55, %v403_v34  ;;  %v723_v59 = vsel %vm714_vm10, %v721_v52, %v722_v53 }
 0x246   :  { %v642_v61 = vrot.slane %v626_v54, 6  ;;  %v758_v62 = vadd.f32 %v719_v2, %v626_v54  ;;  %v413_v63 = vpop.f32.mrb[8].mxu1 }
 0x247   :  { %v775_v0 = vrot.slane %v774_v57, 2  ;;  %v757_v1 = vadd.f32 %v720_v28, %v699_v58  ;;  %v415_v3 = vpop.f32.mrb[9].mxu1  ;;  %v1246_v4 = vpop.f32.mrb[24].mxu0 }
 0x248   :  { %v1248_v5 = vmax.f32 %v594_v40, %v642_v61  ;;  %v779_v6 = vsel %vm714_vm10, %v758_v62, -inf  ;;  %v595_v7 = vadd.f32 %v579_v60, %v415_v3  ;;  %v417_v8 = vpop.f32.mrb[10].mxu1  ;;  %v538_v9 = vpop.f32.mrb[25].mxu0  ;;  %v678_v14 = vrot.slane %v415_v3, 1 }
 0x249   :  { %v776_v10 = vmax.f32 %v774_v57, %v775_v0  ;;  %v780_v11 = vmax.f32 %v757_v1, %v779_v6  ;;  %v419_v12 = vpop.f32.mrb[11].mxu1  ;;  %v1251_v13 = vpop.f32.mrb[26].mxu0  ;;  %v730_v15 = vrot.slane %v1246_v4, 2  ;;  %v727_v21 = vrot.slane %v538_v9, 2  ;;  %v1278_v0 = vld [vmem:[%s1321_s3] ss:$0 sm:$0xff] }
 0x24a   :  { %v611_v16 = vrot.slane %v419_v12, 1  ;;  %v731_v17 = vrot.slane %v1251_v13, 2  ;;  %v1255_v18 = vpop.f32.mrb[27].mxu0  ;;  %v581_v55 = vrot.slane %v538_v9, 1  ;;  %s1079_s3 = smov [#allocation2]  }
 0x24b   :  { %v777_v19 = vrot.slane %v776_v10, 1  ;;  %v781_v20 = vrot.slane %v780_v11, 4  ;;  %v728_v2 = vrot.slane %v1255_v18, 2  ;;  %s895_s22 = sshll.u32 %s1079_s3, 4  ;;  %s896_s22 = int_to_ptr.vmem [resolvable:$true] %s895_s22 }
 0x24c   :  { %v627_v22 = vadd.f32 %v611_v16, %v417_v8  ;;  %v679_v23 = vsel %vm673_vm9, %v678_v14, %v611_v16  ;;  %v1262_v24 = vsel %vm714_vm10, %v730_v15, %v731_v17  ;;  %s1053_s23 = scalar_lea.vmem %s896_s22, 128  ;;  %p1058_p1 = scmp.lt.s32.totalorder %s896_s22, %s896_s22 }
 0x24d   :  { %v778_v25 = vmax.f32 %v776_v10, %v777_v19  ;;  %v782_v26 = vmax.f32 %v780_v11, %v781_v20  ;;  %v700_v27 = vadd.f32 %v679_v23, %v413_v63  ;;  %v729_v28 = vsel %vm714_vm10, %v727_v21, %v728_v2  ;;  %p1054_p0 = scmp.ne.s32.totalorder %s896_s22, %s1053_s23  ;;  %p1059_p2 = scmp.lt.s32.totalorder %s1053_s23, %s1053_s23 }
 0x24e   :  { %v643_v30 = vrot.slane %v627_v22, 6  ;;  %v760_v31 = vadd.f32 %v722_v53, %v627_v22  ;;  %v423_v32 = vpop.f32.mrb[12].mxu1  ;;  %v582_v23 = vrot.slane %v1246_v4, 1 }
 0x24f   :  { %v835_v33 = vmax.f32 %v1232_v38, %v778_v25  ;;  %v783_v34 = vrot.slane %v782_v26, 2  ;;  %v759_v35 = vadd.f32 %v723_v59, %v700_v27  ;;  %v425_v36 = vpop.f32.mrb[13].mxu1  ;;  %p1060_p3 = por %p1059_p2, %p1058_p1 }
 0x250   :  { %v659_v39 = vmax.f32 %v595_v7, %v643_v30  ;;  %v787_v40 = vsel %vm714_vm10, %v760_v31, -inf  ;;  %v596_v41 = vadd.f32 %v580_v29, %v425_v36  ;;  %v427_v42 = vpop.f32.mrb[14].mxu1  ;;  %v680_v47 = vrot.slane %v425_v36, 1 }
 0x251   :  { %v784_v43 = vmax.f32 %v782_v26, %v783_v34  ;;  %v788_v44 = vmax.f32 %v759_v35, %v787_v40  ;;  %v429_v46 = vpop.f32.mrb[15].mxu1  ;;  %p1061_p4 = pnand %p1060_p3, %p1054_p0 }
 0x252   :  { %v612_v48 = vrot.slane %v429_v46, 1 }
 0x253   :  { %v785_v50 = vrot.slane %v784_v43, 1  ;;  %v789_v37 = vrot.slane %v788_v44, 4 }
 0x254   :  { %v628_v51 = vadd.f32 %v612_v48, %v427_v42  ;;  %v681_v52 = vsel %vm673_vm9, %v680_v47, %v612_v48 }
 0x255   :  { %v786_v53 = vmax.f32 %v784_v43, %v785_v50  ;;  %v790_v38 = vmax.f32 %v788_v44, %v789_v37  ;;  %v701_v54 = vadd.f32 %v681_v52, %v423_v32 }
 0x256   :  { %v644_v57 = vrot.slane %v628_v51, 6  ;;  %v762_v58 = vadd.f32 %v725_v49, %v628_v51  ;;  %v433_v59 = vpop.f32.mrb[16].mxu1 }
 0x257   :  { %v836_v60 = vmax.f32 %v1248_v5, %v786_v53  ;;  %v791_v61 = vrot.slane %v790_v38, 2  ;;  %v761_v62 = vadd.f32 %v1243_v56, %v701_v54  ;;  %v435_v63 = vpop.f32.mrb[17].mxu1  ;;  %v850_v56 = vadd.f32 %v1278_v0, %v835_v33 }
 0x258   :  { %v660_v1 = vmax.f32 %v596_v41, %v644_v57  ;;  %v795_v3 = vsel %vm714_vm10, %v762_v58, -inf  ;;  %v597_v6 = vadd.f32 %v581_v55, %v435_v63  ;;  %v437_v7 = vpop.f32.mrb[18].mxu1  ;;  %v682_v5 = vrot.slane %v435_v63, 1 }
 0x259   :  { %v851_v45 = vadd.f32 %v1278_v0, %v836_v60  ;;  %v792_v49 = vmax.f32 %v790_v38, %v791_v61  ;;  %v796_v8 = vmax.f32 %v761_v62, %v795_v3  ;;  %v439_v9 = vpop.f32.mrb[19].mxu1 }
 0x25a   :  { %v613_v10 = vrot.slane %v439_v9, 1 }
 0x25b   :  { %v866_v11 = vrot.slane %v851_v45, 7  ;;  %v793_v12 = vrot.slane %v792_v49, 1  ;;  %v797_v14 = vrot.slane %v796_v8, 4 }
 0x25c   :  { %v629_v15 = vadd.f32 %v613_v10, %v437_v7  ;;  %v683_v16 = vsel %vm673_vm9, %v682_v5, %v613_v10 }
 0x25d   :  { %v794_v19 = vmax.f32 %v792_v49, %v793_v12  ;;  %v798_v20 = vmax.f32 %v796_v8, %v797_v14  ;;  %v702_v21 = vadd.f32 %v683_v16, %v433_v59  ;;  %v868_v22 = vsel %vm867_vm11, %v866_v11, %v850_v56 }
 0x25e   :  { %v645_v25 = vrot.slane %v629_v15, 6  ;;  %v764_v26 = vadd.f32 %v728_v2, %v629_v15  ;;  %v443_v27 = vpop.f32.mrb[20].mxu1 }
 0x25f   :  { %v837_v29 = vmax.f32 %v659_v39, %v794_v19  ;;  %v799_v30 = vrot.slane %v798_v20, 2  ;;  %v763_v31 = vadd.f32 %v729_v28, %v702_v21  ;;  %v445_v32 = vpop.f32.mrb[21].mxu1 }
 0x260   :  { %v661_v33 = vmax.f32 %v597_v6, %v645_v25  ;;  %v803_v34 = vsel %vm714_vm10, %v764_v26, -inf  ;;  %v598_v35 = vadd.f32 %v582_v23, %v445_v32  ;;  %v447_v36 = vpop.f32.mrb[22].mxu1  ;;  %v684_v4 = vrot.slane %v445_v32, 1 }
 0x261   :  { %v852_v40 = vadd.f32 %v1278_v0, %v837_v29  ;;  %v800_v41 = vmax.f32 %v798_v20, %v799_v30  ;;  %v804_v42 = vmax.f32 %v763_v31, %v803_v34  ;;  %v449_v43 = vpop.f32.mrb[23].mxu1 }
 0x262   :  { %v614_v44 = vrot.slane %v449_v43, 1 }
 0x263   :  { %v869_v18 = vrot.slane %v852_v40, 6  ;;  %v801_v2 = vrot.slane %v800_v41, 1  ;;  %v805_v46 = vrot.slane %v804_v42, 4 }
 0x264   :  { %v630_v39 = vadd.f32 %v614_v44, %v447_v36  ;;  %v685_v28 = vsel %vm673_vm9, %v684_v4, %v614_v44 }
 0x265   :  { %v802_v47 = vmax.f32 %v800_v41, %v801_v2  ;;  %v806_v48 = vmax.f32 %v804_v42, %v805_v46  ;;  %v703_v50 = vadd.f32 %v685_v28, %v443_v27  ;;  %v871_v37 = vsel %vm870_vm12, %v869_v18, %v868_v22 }
 0x266   :  { %v646_v51 = vrot.slane %v630_v39, 6  ;;  %v766_v52 = vadd.f32 %v731_v17, %v630_v39  ;;  %v453_v53 = vpop.f32.mrb[24].mxu1 }
 0x267   :  { %v838_v38 = vmax.f32 %v660_v1, %v802_v47  ;;  %v807_v54 = vrot.slane %v806_v48, 2  ;;  %v765_v55 = vadd.f32 %v1262_v24, %v703_v50  ;;  %v455_v57 = vpop.f32.mrb[25].mxu1 }
 0x268   :  { %v662_v58 = vmax.f32 %v598_v35, %v646_v51  ;;  %v811_v59 = vsel %vm714_vm10, %v766_v52, -inf  ;;  %v457_v60 = vpop.f32.mrb[26].mxu1  ;;  %v686_v6 = vrot.slane %v455_v57, 1 }
 0x269   :  { %v853_v61 = vadd.f32 %v1278_v0, %v838_v38  ;;  %v808_v62 = vmax.f32 %v806_v48, %v807_v54  ;;  %v812_v63 = vmax.f32 %v765_v55, %v811_v59  ;;  %v459_v3 = vpop.f32.mrb[27].mxu1 }
 0x26a   :  { %v615_v7 = vrot.slane %v459_v3, 1 }
 0x26b   :  { %v872_v13 = vrot.slane %v853_v61, 5  ;;  %v809_v17 = vrot.slane %v808_v62, 1  ;;  %v813_v45 = vrot.slane %v812_v63, 4 }
 0x26c   :  { %v631_v1 = vadd.f32 %v615_v7, %v457_v60  ;;  %v687_v49 = vsel %vm673_vm9, %v686_v6, %v615_v7 }
 0x26d   :  { %v810_v24 = vmax.f32 %v808_v62, %v809_v17  ;;  %v814_v8 = vmax.f32 %v812_v63, %v813_v45  ;;  %v704_v9 = vadd.f32 %v687_v49, %v453_v53  ;;  %v874_v5 = vsel %vm873_vm13, %v872_v13, %v871_v37 }
 0x26e   :  { %v463_v10 = vpop.f32.mrb[28].mxu1  ;;  %v647_v18 = vrot.slane %v631_v1, 6 }
 0x26f   :  { %v839_v56 = vmax.f32 %v661_v33, %v810_v24  ;;  %v815_v11 = vrot.slane %v814_v8, 2  ;;  %v465_v12 = vpop.f32.mrb[29].mxu1 }
 0x270   :  { %v467_v14 = vpop.f32.mrb[30].mxu1  ;;  %v688_v20 = vrot.slane %v465_v12, 1 }
 0x271   :  { %v854_v15 = vadd.f32 %v1278_v0, %v839_v56  ;;  %v816_v16 = vmax.f32 %v814_v8, %v815_v11  ;;  %v469_v19 = vpop.f32.mrb[31].mxu1 }
 0x272   :  { %v616_v21 = vrot.slane %v469_v19, 1 }
 0x273   :  { %v875_v22 = vrot.slane %v854_v15, 4  ;;  %v817_v23 = vrot.slane %v816_v16, 1 }
 0x274   :  { %v632_v25 = vadd.f32 %v616_v21, %v467_v14  ;;  %v689_v26 = vsel %vm673_vm9, %v688_v20, %v616_v21 }
 0x275   :  { %v818_v27 = vmax.f32 %v816_v16, %v817_v23  ;;  %v705_v29 = vadd.f32 %v689_v26, %v463_v10  ;;  %v877_v30 = vsel %vm876_vm14, %v875_v22, %v874_v5 }
 0x276   :  { %v1026_v31 = vpop.f32.mrb[32].mxu1  ;;  %v648_v35 = vrot.slane %v632_v25, 6 }
 0x277   :  { %v840_v32 = vmax.f32 %v662_v58, %v818_v27  ;;  %v584_v33 = vrot.slane %v1026_v31, 1  ;;  %v554_v34 = vpop.f32.mrb[33].mxu1  ;;  %v736_v43 = vrot.slane %v1026_v31, 2 }
 0x278   :  { %v583_v36 = vrot.slane %v554_v34, 1  ;;  %v1027_v40 = vpop.f32.mrb[34].mxu1  ;;  %v733_v46 = vrot.slane %v554_v34, 2 }
 0x279   :  { %v855_v41 = vadd.f32 %v1278_v0, %v840_v32  ;;  %v600_v42 = vadd.f32 %v584_v33, %v465_v12  ;;  %v737_v4 = vrot.slane %v1027_v40, 2  ;;  %v557_v44 = vpop.f32.mrb[35].mxu1 }
 0x27a   :  { %v599_v2 = vadd.f32 %v583_v36, %v455_v57  ;;  %v734_v39 = vrot.slane %v557_v44, 2 }
 0x27b   :  { %v664_v28 = vmax.f32 %v600_v42, %v648_v35  ;;  %v738_v47 = vsel %vm714_vm10, %v736_v43, %v737_v4  ;;  %v770_v48 = vadd.f32 %v737_v4, %v632_v25  ;;  %v878_v50 = vrot.slane %v855_v41, 3 }
 0x27c   :  { %v663_v37 = vmax.f32 %v599_v2, %v647_v18  ;;  %v769_v51 = vadd.f32 %v738_v47, %v705_v29  ;;  %v735_v52 = vsel %vm714_vm10, %v733_v46, %v734_v39  ;;  %v768_v53 = vadd.f32 %v734_v39, %v631_v1 }
 0x27d   :  { %v827_v38 = vsel %vm714_vm10, %v770_v48, -inf  ;;  %v767_v54 = vadd.f32 %v735_v52, %v704_v9  ;;  %v880_v55 = vsel %vm879_vm15, %v878_v50, %v877_v30 }
 0x27e   :  { %v828_v58 = vmax.f32 %v769_v51, %v827_v38  ;;  %v819_v57 = vsel %vm714_vm10, %v768_v53, -inf }
 0x27f   :  { %v820_v59 = vmax.f32 %v767_v54, %v819_v57 }
 0x280   :  { %v829_v60 = vrot.slane %v828_v58, 4 }
 0x281   :  { %v821_v61 = vrot.slane %v820_v59, 4 }
 0x282   :  { %v830_v62 = vmax.f32 %v828_v58, %v829_v60 }
 0x283   :  { %v822_v63 = vmax.f32 %v820_v59, %v821_v61 }
 0x284   :  { %v831_v3 = vrot.slane %v830_v62, 2 }
 0x285   :  { %v823_v6 = vrot.slane %v822_v63, 2 }
 0x286   :  { %v832_v7 = vmax.f32 %v830_v62, %v831_v3 }
 0x287   :  { %v824_v13 = vmax.f32 %v822_v63, %v823_v6 }
 0x288   :  { %v833_v17 = vrot.slane %v832_v7, 1 }
 0x289   :  { %v825_v45 = vrot.slane %v824_v13, 1 }
 0x28a   :  { %v834_v1 = vmax.f32 %v832_v7, %v833_v17 }
 0x28b   :  { %v826_v49 = vmax.f32 %v824_v13, %v825_v45 }
 0x28c   :  { %v842_v24 = vmax.f32 %v664_v28, %v834_v1 }
 0x28d   :  { %v841_v8 = vmax.f32 %v663_v37, %v826_v49 }
 0x28e   :  { %v857_v9 = vadd.f32 %v1278_v0, %v842_v24 }
 0x28f   :  { %v856_v5 = vadd.f32 %v1278_v0, %v841_v8 }
 0x290   :  { %v884_v56 = vrot.slane %v857_v9, 1 }
 0x291   :  { %v881_v10 = vrot.slane %v856_v5, 2 }
 0x293   :  { %v883_v11 = vsel %vm882_vm0, %v881_v10, %v880_v55 }
 0x294   :  { %v886_v12 = vsel %vm885_vm1, %v884_v56, %v883_v11 }
 0x295   :  { %888 = vst [vmem:[#allocation2] sm:$0xff] %v886_v12 }
 0x296   :  { %1064 = shalt.err (!%p1061_p4)
}
 0x297   :  { %s1065_s26 = scalar_lea.hbm %s1322_s4, 128 }
 0x298   :  { %p1066_p5 = scmp.ne.s32.totalorder %s1322_s4, %s1065_s26  ;;  %p1069_p6 = scmp.lt.u32.totalorder %s1065_s26, %s1322_s4 }
 0x29a   :  { %p1071_p7 = pnand %p1069_p6, %p1066_p5 }
 0x29c   :  { %1074 = shalt.err (!%p1071_p7)
}
 0x29d   :  { %898 = dma.vmem_to_hbm [thread:$0]  %s896_s22, 128, %s1322_s4, [#allocation3]  }
 0x29e   :  { %1075 = dma.done.wait [#allocation3], 128  }
 0x29f   :  { %1076 = vsyncadd [#allocation3], 4294967168 }
 0x2a0   :  { %902 = vsyncpa [#allocation3], 1 }

</bundles_post_ra>
